<compile_context>
chip_gen: v7x
topology: tpu7x:2x2x1
jax: 0.10.0
libtpu: 0.0.40
codegen_flags: <defaults>
</compile_context>

<pallas_src>
import jax
import jax.numpy as jnp
import numpy as np
from jax.experimental import pallas as pl
from jax.experimental.pallas import tpu as pltpu

EPS = 1e-5                     # nn.BatchNorm2d default eps
MATMUL_DTYPE = jnp.bfloat16    # MXU operand dtype (accumulation is f32)


def _make_basic_block_kernel(N, H, W, C, P):
    """Build the kernel closure for static shapes (N, H, W, C, P)."""
    M = N * H * W
    taps = [(dy - 1, dx - 1) for dy in range(3) for dx in range(3)]

    def shift_lanes(v, s):
        # result[:, m] = v[:, (m + s) % M]; wrapped entries are masked out later.
        if s == 0:
            return v
        return jnp.concatenate([v[:, s:], v[:, :s]], axis=1)

    def kernel(coord_ref, x_ref, w1_ref, g1_ref, b1_ref, w2_ref, g2_ref,
               b2_ref, o_ref):
        # coord_ref: (2, M) int32 -> row 0 = y coordinate, row 1 = x coordinate
        y_id = coord_ref[0:1, :]
        x_id = coord_ref[1:2, :]

        # Per-tap validity masks (0/1 in f32), built once and reused by both convs.
        def tap_mask(oy, ox):
            ok = None
            if oy < 0:
                ok = y_id >= -oy
            elif oy > 0:
                ok = y_id < H - oy
            if ox < 0:
                c = x_id >= -ox
                ok = c if ok is None else (ok & c)
            elif ox > 0:
                c = x_id < W - ox
                ok = c if ok is None else (ok & c)
            if ok is None:               # center tap: always valid
                return None
            return jnp.where(ok, 1.0, 0.0)          # (1, M) f32

        masks = [tap_mask(oy, ox) for (oy, ox) in taps]

        def im2col(v):
            # v: (channels, M) f32  ->  (9*channels, M) f32
            cols = []
            for (oy, ox), mask in zip(taps, masks):
                t = shift_lanes(v, oy * W + ox)
                if mask is not None:
                    t = t * mask
                cols.append(t)
            return jnp.concatenate(cols, axis=0)

        def batchnorm(acc, g_ref, b_ref, relu):
            # acc: (P, M) f32; fused single pass for sum and sum-of-squares.
            s1 = jnp.sum(acc, axis=1, keepdims=True)
            s2 = jnp.sum(acc * acc, axis=1, keepdims=True)
            mean = s1 * (1.0 / M)
            var = s2 * (1.0 / M) - mean * mean        # biased variance
            scale = jax.lax.rsqrt(var + EPS) * g_ref[...]
            out = (acc - mean) * scale + b_ref[...]
            return jnp.maximum(out, 0.0) if relu else out

        # ---- conv1 (3x3 / stride 1 / pad 1) as a single im2col MXU matmul ----
        xcol = im2col(x_ref[...]).astype(MATMUL_DTYPE)           # (9C, M) bf16
        acc1 = jnp.dot(w1_ref[...], xcol,
                       preferred_element_type=jnp.float32)       # (P, M) f32
        y1 = batchnorm(acc1, g1_ref, b1_ref, relu=True)

        # ---- conv2 ----
        ycol = im2col(y1).astype(MATMUL_DTYPE)                   # (9P, M) bf16
        acc2 = jnp.dot(w2_ref[...], ycol,
                       preferred_element_type=jnp.float32)       # (P, M) f32
        y2 = batchnorm(acc2, g2_ref, b2_ref, relu=False)

        # ---- residual add (identity path, Cin == P) + ReLU ----
        # Re-read the residual from the input ref here to keep live ranges short.
        out = jnp.maximum(y2 + x_ref[...], 0.0)
        o_ref[...] = out.astype(o_ref.dtype)

    return kernel


def basic_block_pallas(x_nchw, w1, g1, b1, w2, g2, b2):
    """BasicBlock forward. x: (N, C, H, W); conv weights are HWIO (3, 3, Cin, P)."""
    N, C, H, W = x_nchw.shape
    P = w1.shape[-1]
    assert C == P, "downsample=None requires inplanes == planes (stride 1)"
    M = N * H * W

    # Lane-dense layout: channels on sublanes, flattened spatial (M) on lanes.
    x_cm = jnp.transpose(x_nchw, (1, 0, 2, 3)).reshape(C, M).astype(jnp.float32)

    # Static per-position (row, col) coordinates for the in-kernel halo masks.
    m_idx = jnp.arange(M, dtype=jnp.int32)
    coords = jnp.stack([(m_idx // W) % H, m_idx % W], axis=0)      # (2, M) int32

    # Conv weights as W^T: (P, 9*Cin) with k = (dy*3 + dx)*Cin + c, in bf16.
    w1t = jnp.transpose(w1.reshape(9 * C, P)).astype(MATMUL_DTYPE)
    w2t = jnp.transpose(w2.reshape(9 * P, P)).astype(MATMUL_DTYPE)
    g1c = g1.reshape(P, 1).astype(jnp.float32)
    b1c = b1.reshape(P, 1).astype(jnp.float32)
    g2c = g2.reshape(P, 1).astype(jnp.float32)
    b2c = b2.reshape(P, 1).astype(jnp.float32)

    flops = 2 * M * (9 * C * P + 9 * P * P) + 12 * M * P
    bytes_accessed = (coords.size * 4 + x_cm.size * 4
                      + (w1t.size + w2t.size) * 2 + 4 * P * 4 + P * M * 4)

    # TODO(synk): for production ResNet shapes (e.g. N=8, 56x56x64) this
    # whole-tensor-resident design should become a grid over M-tiles with
    # two-pass BN (tile-local sum/sumsq accumulated over an "arbitrary" axis,
    # then a normalization sweep) so it pipelines through VMEM and shards over
    # both v7x TensorCores; at this toy size the block uses well under 1 MiB.
    out_cm = pl.pallas_call(
        _make_basic_block_kernel(N, H, W, C, P),
        out_shape=jax.ShapeDtypeStruct((P, M), jnp.float32),
        in_specs=[pl.BlockSpec(memory_space=pltpu.MemorySpace.VMEM)] * 8,
        out_specs=pl.BlockSpec(memory_space=pltpu.MemorySpace.VMEM),
        compiler_params=pltpu.CompilerParams(vmem_limit_bytes=32 * 1024 * 1024),
        cost_estimate=pl.CostEstimate(flops=flops, transcendentals=2 * P,
                                      bytes_accessed=bytes_accessed),
    )(coords, x_cm, w1t, g1c, b1c, w2t, g2c, b2c)

    out_nchw = jnp.transpose(out_cm.reshape(P, N, H, W), (1, 0, 2, 3))
    return out_nchw.astype(x_nchw.dtype)


def basic_block_ref(x_nchw, w1, g1, b1, w2, g2, b2, conv_dtype=jnp.float32):
    """Pure-JAX reference; conv_dtype controls the conv operand precision."""
    x = jnp.transpose(x_nchw, (0, 2, 3, 1)).astype(jnp.float32)

    def conv(v, w):
        return jax.lax.conv_general_dilated(
            v.astype(conv_dtype), w.astype(conv_dtype), (1, 1), "SAME",
            dimension_numbers=("NHWC", "HWIO", "NHWC"),
            preferred_element_type=jnp.float32)

    def bn(v, g, b):
        m = jnp.mean(v, axis=(0, 1, 2), keepdims=True)
        var = jnp.mean((v - m) ** 2, axis=(0, 1, 2), keepdims=True)
        return (v - m) * jax.lax.rsqrt(var + EPS) * g + b

    out = jax.nn.relu(bn(conv(x, w1), g1, b1))
    out = bn(conv(out, w2), g2, b2)
    out = jax.nn.relu(out + x)
    return jnp.transpose(out, (0, 3, 1, 2))


if __name__ == "__main__":
    # Small shapes consistent with the module: inplanes = planes = 4, stride=1.
    N, C, H, W = 2, 4, 16, 16
    P = C

    key = jax.random.PRNGKey(0)
    kx, k1, k2, kg1, kb1, kg2, kb2 = jax.random.split(key, 7)

    x = jax.random.normal(kx, (N, C, H, W), jnp.float32)
    w1 = jax.random.normal(k1, (3, 3, C, P), jnp.float32) * np.sqrt(2.0 / (9 * C))
    w2 = jax.random.normal(k2, (3, 3, P, P), jnp.float32) * np.sqrt(2.0 / (9 * P))
    g1 = 1.0 + 0.1 * jax.random.normal(kg1, (P,), jnp.float32)
    b1 = 0.1 * jax.random.normal(kb1, (P,), jnp.float32)
    g2 = 1.0 + 0.1 * jax.random.normal(kg2, (P,), jnp.float32)
    b2 = 0.1 * jax.random.normal(kb2, (P,), jnp.float32)

    out = jax.block_until_ready(basic_block_pallas(x, w1, g1, b1, w2, g2, b2))

    # Tight check vs. a reference using the same bf16 conv-operand precision.
    ref_mixed = jax.block_until_ready(
        basic_block_ref(x, w1, g1, b1, w2, g2, b2, conv_dtype=MATMUL_DTYPE))
    np.testing.assert_allclose(np.asarray(out), np.asarray(ref_mixed),
                               rtol=1e-2, atol=1e-2)

    # Looser check vs. the full-f32 module semantics (difference = bf16 operand
    # rounding on the MXU path only).
    ref_f32 = jax.block_until_ready(
        basic_block_ref(x, w1, g1, b1, w2, g2, b2, conv_dtype=jnp.float32))
    np.testing.assert_allclose(np.asarray(out), np.asarray(ref_f32),
                               rtol=5e-2, atol=5e-2)

    print("KERNEL_OK")
</pallas_src>

<mosaic_0001>
module attributes {stable_mosaic.version = 11 : i64} {
  func.func @kernel(%arg0: memref<2x512xi32, #tpu.memory_space<vmem>>, %arg1: memref<4x512xf32, #tpu.memory_space<vmem>>, %arg2: memref<4x36xbf16, #tpu.memory_space<vmem>>, %arg3: memref<4x1xf32, #tpu.memory_space<vmem>>, %arg4: memref<4x1xf32, #tpu.memory_space<vmem>>, %arg5: memref<4x36xbf16, #tpu.memory_space<vmem>>, %arg6: memref<4x1xf32, #tpu.memory_space<vmem>>, %arg7: memref<4x1xf32, #tpu.memory_space<vmem>>, %arg8: memref<4x512xf32, #tpu.memory_space<vmem>>) attributes {dimension_semantics = [], scalar_prefetch = 0 : i64, scratch_operands = 0 : i64, tpu.core_type = #tpu.core_type<tc>} {
    %c0 = arith.constant 0 : index
    %c0_0 = arith.constant 0 : index
    %0 = vector.load %arg0[%c0, %c0_0] : memref<2x512xi32, #tpu.memory_space<vmem>>, vector<1x512xi32>
    %c1 = arith.constant 1 : index
    %c0_1 = arith.constant 0 : index
    %1 = vector.load %arg0[%c1, %c0_1] : memref<2x512xi32, #tpu.memory_space<vmem>>, vector<1x512xi32>
    %c1_i32 = arith.constant 1 : i32
    %2 = vector.broadcast %c1_i32 : i32 to vector<1x512xi32>
    %3 = arith.cmpi sge, %0, %2 : vector<1x512xi32>
    %c1_i32_2 = arith.constant 1 : i32
    %4 = vector.broadcast %c1_i32_2 : i32 to vector<1x512xi32>
    %5 = arith.cmpi sge, %1, %4 : vector<1x512xi32>
    %6 = arith.andi %3, %5 : vector<1x512xi1>
    %cst = arith.constant 1.000000e+00 : f32
    %cst_3 = arith.constant 0.000000e+00 : f32
    %7 = vector.broadcast %cst : f32 to vector<1x512xf32>
    %8 = vector.broadcast %cst_3 : f32 to vector<1x512xf32>
    %9 = arith.select %6, %7, %8 : vector<1x512xi1>, vector<1x512xf32>
    %c1_i32_4 = arith.constant 1 : i32
    %10 = vector.broadcast %c1_i32_4 : i32 to vector<1x512xi32>
    %11 = arith.cmpi sge, %0, %10 : vector<1x512xi32>
    %cst_5 = arith.constant 1.000000e+00 : f32
    %cst_6 = arith.constant 0.000000e+00 : f32
    %12 = vector.broadcast %cst_5 : f32 to vector<1x512xf32>
    %13 = vector.broadcast %cst_6 : f32 to vector<1x512xf32>
    %14 = arith.select %11, %12, %13 : vector<1x512xi1>, vector<1x512xf32>
    %c1_i32_7 = arith.constant 1 : i32
    %15 = vector.broadcast %c1_i32_7 : i32 to vector<1x512xi32>
    %16 = arith.cmpi sge, %0, %15 : vector<1x512xi32>
    %c15_i32 = arith.constant 15 : i32
    %17 = vector.broadcast %c15_i32 : i32 to vector<1x512xi32>
    %18 = arith.cmpi slt, %1, %17 : vector<1x512xi32>
    %19 = arith.andi %16, %18 : vector<1x512xi1>
    %cst_8 = arith.constant 1.000000e+00 : f32
    %cst_9 = arith.constant 0.000000e+00 : f32
    %20 = vector.broadcast %cst_8 : f32 to vector<1x512xf32>
    %21 = vector.broadcast %cst_9 : f32 to vector<1x512xf32>
    %22 = arith.select %19, %20, %21 : vector<1x512xi1>, vector<1x512xf32>
    %c1_i32_10 = arith.constant 1 : i32
    %23 = vector.broadcast %c1_i32_10 : i32 to vector<1x512xi32>
    %24 = arith.cmpi sge, %1, %23 : vector<1x512xi32>
    %cst_11 = arith.constant 1.000000e+00 : f32
    %cst_12 = arith.constant 0.000000e+00 : f32
    %25 = vector.broadcast %cst_11 : f32 to vector<1x512xf32>
    %26 = vector.broadcast %cst_12 : f32 to vector<1x512xf32>
    %27 = arith.select %24, %25, %26 : vector<1x512xi1>, vector<1x512xf32>
    %c15_i32_13 = arith.constant 15 : i32
    %28 = vector.broadcast %c15_i32_13 : i32 to vector<1x512xi32>
    %29 = arith.cmpi slt, %1, %28 : vector<1x512xi32>
    %cst_14 = arith.constant 1.000000e+00 : f32
    %cst_15 = arith.constant 0.000000e+00 : f32
    %30 = vector.broadcast %cst_14 : f32 to vector<1x512xf32>
    %31 = vector.broadcast %cst_15 : f32 to vector<1x512xf32>
    %32 = arith.select %29, %30, %31 : vector<1x512xi1>, vector<1x512xf32>
    %c15_i32_16 = arith.constant 15 : i32
    %33 = vector.broadcast %c15_i32_16 : i32 to vector<1x512xi32>
    %34 = arith.cmpi slt, %0, %33 : vector<1x512xi32>
    %c1_i32_17 = arith.constant 1 : i32
    %35 = vector.broadcast %c1_i32_17 : i32 to vector<1x512xi32>
    %36 = arith.cmpi sge, %1, %35 : vector<1x512xi32>
    %37 = arith.andi %34, %36 : vector<1x512xi1>
    %cst_18 = arith.constant 1.000000e+00 : f32
    %cst_19 = arith.constant 0.000000e+00 : f32
    %38 = vector.broadcast %cst_18 : f32 to vector<1x512xf32>
    %39 = vector.broadcast %cst_19 : f32 to vector<1x512xf32>
    %40 = arith.select %37, %38, %39 : vector<1x512xi1>, vector<1x512xf32>
    %c15_i32_20 = arith.constant 15 : i32
    %41 = vector.broadcast %c15_i32_20 : i32 to vector<1x512xi32>
    %42 = arith.cmpi slt, %0, %41 : vector<1x512xi32>
    %cst_21 = arith.constant 1.000000e+00 : f32
    %cst_22 = arith.constant 0.000000e+00 : f32
    %43 = vector.broadcast %cst_21 : f32 to vector<1x512xf32>
    %44 = vector.broadcast %cst_22 : f32 to vector<1x512xf32>
    %45 = arith.select %42, %43, %44 : vector<1x512xi1>, vector<1x512xf32>
    %c15_i32_23 = arith.constant 15 : i32
    %46 = vector.broadcast %c15_i32_23 : i32 to vector<1x512xi32>
    %47 = arith.cmpi slt, %0, %46 : vector<1x512xi32>
    %c15_i32_24 = arith.constant 15 : i32
    %48 = vector.broadcast %c15_i32_24 : i32 to vector<1x512xi32>
    %49 = arith.cmpi slt, %1, %48 : vector<1x512xi32>
    %50 = arith.andi %47, %49 : vector<1x512xi1>
    %cst_25 = arith.constant 1.000000e+00 : f32
    %cst_26 = arith.constant 0.000000e+00 : f32
    %51 = vector.broadcast %cst_25 : f32 to vector<1x512xf32>
    %52 = vector.broadcast %cst_26 : f32 to vector<1x512xf32>
    %53 = arith.select %50, %51, %52 : vector<1x512xi1>, vector<1x512xf32>
    %c0_27 = arith.constant 0 : index
    %c0_28 = arith.constant 0 : index
    %54 = vector.load %arg1[%c0_27, %c0_28] : memref<4x512xf32, #tpu.memory_space<vmem>>, vector<4x512xf32>
    %55 = vector.extract_strided_slice %54 {offsets = [0, 495], sizes = [4, 17], strides = [1, 1]} : vector<4x512xf32> to vector<4x17xf32>
    %56 = vector.extract_strided_slice %54 {offsets = [0, 0], sizes = [4, 495], strides = [1, 1]} : vector<4x512xf32> to vector<4x495xf32>
    %57 = tpu.concatenate %55, %56 in 1 : vector<4x17xf32>, vector<4x495xf32> -> vector<4x512xf32>
    %58 = vector.broadcast %9 : vector<1x512xf32> to vector<4x512xf32>
    %59 = arith.mulf %57, %58 : vector<4x512xf32>
    %60 = vector.extract_strided_slice %54 {offsets = [0, 496], sizes = [4, 16], strides = [1, 1]} : vector<4x512xf32> to vector<4x16xf32>
    %61 = vector.extract_strided_slice %54 {offsets = [0, 0], sizes = [4, 496], strides = [1, 1]} : vector<4x512xf32> to vector<4x496xf32>
    %62 = tpu.concatenate %60, %61 in 1 : vector<4x16xf32>, vector<4x496xf32> -> vector<4x512xf32>
    %63 = vector.broadcast %14 : vector<1x512xf32> to vector<4x512xf32>
    %64 = arith.mulf %62, %63 : vector<4x512xf32>
    %65 = vector.extract_strided_slice %54 {offsets = [0, 497], sizes = [4, 15], strides = [1, 1]} : vector<4x512xf32> to vector<4x15xf32>
    %66 = vector.extract_strided_slice %54 {offsets = [0, 0], sizes = [4, 497], strides = [1, 1]} : vector<4x512xf32> to vector<4x497xf32>
    %67 = tpu.concatenate %65, %66 in 1 : vector<4x15xf32>, vector<4x497xf32> -> vector<4x512xf32>
    %68 = vector.broadcast %22 : vector<1x512xf32> to vector<4x512xf32>
    %69 = arith.mulf %67, %68 : vector<4x512xf32>
    %70 = vector.extract_strided_slice %54 {offsets = [0, 511], sizes = [4, 1], strides = [1, 1]} : vector<4x512xf32> to vector<4x1xf32>
    %71 = vector.extract_strided_slice %54 {offsets = [0, 0], sizes = [4, 511], strides = [1, 1]} : vector<4x512xf32> to vector<4x511xf32>
    %72 = tpu.concatenate %70, %71 in 1 : vector<4x1xf32>, vector<4x511xf32> -> vector<4x512xf32>
    %73 = vector.broadcast %27 : vector<1x512xf32> to vector<4x512xf32>
    %74 = arith.mulf %72, %73 : vector<4x512xf32>
    %75 = vector.extract_strided_slice %54 {offsets = [0, 1], sizes = [4, 511], strides = [1, 1]} : vector<4x512xf32> to vector<4x511xf32>
    %76 = vector.extract_strided_slice %54 {offsets = [0, 0], sizes = [4, 1], strides = [1, 1]} : vector<4x512xf32> to vector<4x1xf32>
    %77 = tpu.concatenate %75, %76 in 1 : vector<4x511xf32>, vector<4x1xf32> -> vector<4x512xf32>
    %78 = vector.broadcast %32 : vector<1x512xf32> to vector<4x512xf32>
    %79 = arith.mulf %77, %78 : vector<4x512xf32>
    %80 = vector.extract_strided_slice %54 {offsets = [0, 15], sizes = [4, 497], strides = [1, 1]} : vector<4x512xf32> to vector<4x497xf32>
    %81 = vector.extract_strided_slice %54 {offsets = [0, 0], sizes = [4, 15], strides = [1, 1]} : vector<4x512xf32> to vector<4x15xf32>
    %82 = tpu.concatenate %80, %81 in 1 : vector<4x497xf32>, vector<4x15xf32> -> vector<4x512xf32>
    %83 = vector.broadcast %40 : vector<1x512xf32> to vector<4x512xf32>
    %84 = arith.mulf %82, %83 : vector<4x512xf32>
    %85 = vector.extract_strided_slice %54 {offsets = [0, 16], sizes = [4, 496], strides = [1, 1]} : vector<4x512xf32> to vector<4x496xf32>
    %86 = vector.extract_strided_slice %54 {offsets = [0, 0], sizes = [4, 16], strides = [1, 1]} : vector<4x512xf32> to vector<4x16xf32>
    %87 = tpu.concatenate %85, %86 in 1 : vector<4x496xf32>, vector<4x16xf32> -> vector<4x512xf32>
    %88 = vector.broadcast %45 : vector<1x512xf32> to vector<4x512xf32>
    %89 = arith.mulf %87, %88 : vector<4x512xf32>
    %90 = vector.extract_strided_slice %54 {offsets = [0, 17], sizes = [4, 495], strides = [1, 1]} : vector<4x512xf32> to vector<4x495xf32>
    %91 = vector.extract_strided_slice %54 {offsets = [0, 0], sizes = [4, 17], strides = [1, 1]} : vector<4x512xf32> to vector<4x17xf32>
    %92 = tpu.concatenate %90, %91 in 1 : vector<4x495xf32>, vector<4x17xf32> -> vector<4x512xf32>
    %93 = vector.broadcast %53 : vector<1x512xf32> to vector<4x512xf32>
    %94 = arith.mulf %92, %93 : vector<4x512xf32>
    %95 = tpu.concatenate %59, %64, %69, %74, %54, %79, %84, %89, %94 in 0 : vector<4x512xf32>, vector<4x512xf32>, vector<4x512xf32>, vector<4x512xf32>, vector<4x512xf32>, vector<4x512xf32>, vector<4x512xf32>, vector<4x512xf32>, vector<4x512xf32> -> vector<36x512xf32>
    %96 = arith.truncf %95 : vector<36x512xf32> to vector<36x512xbf16>
    %c0_29 = arith.constant 0 : index
    %c0_30 = arith.constant 0 : index
    %97 = vector.load %arg2[%c0_29, %c0_30] : memref<4x36xbf16, #tpu.memory_space<vmem>>, vector<4x36xbf16>
    %cst_31 = arith.constant dense<0.000000e+00> : vector<4x512xf32>
    %98 = tpu.matmul %97, %96, %cst_31 {dimension_numbers = #tpu.dot_dimension_numbers<[1], [0], [0], [1], [0, 0, 1, 1], [], []>} : vector<4x36xbf16>, vector<36x512xbf16>, vector<4x512xf32> -> vector<4x512xf32>
    %cst_32 = arith.constant dense<0.000000e+00> : vector<4xf32>
    %99 = vector.multi_reduction <add>, %98, %cst_32 [1] : vector<4x512xf32> to vector<4xf32>
    %100 = vector.shape_cast %99 : vector<4xf32> to vector<4x1xf32>
    %101 = arith.mulf %98, %98 : vector<4x512xf32>
    %cst_33 = arith.constant dense<0.000000e+00> : vector<4xf32>
    %102 = vector.multi_reduction <add>, %101, %cst_33 [1] : vector<4x512xf32> to vector<4xf32>
    %103 = vector.shape_cast %102 : vector<4xf32> to vector<4x1xf32>
    %cst_34 = arith.constant 0.001953125 : f32
    %104 = vector.broadcast %cst_34 : f32 to vector<4x1xf32>
    %105 = arith.mulf %100, %104 : vector<4x1xf32>
    %cst_35 = arith.constant 0.001953125 : f32
    %106 = vector.broadcast %cst_35 : f32 to vector<4x1xf32>
    %107 = arith.mulf %103, %106 : vector<4x1xf32>
    %108 = arith.mulf %105, %105 : vector<4x1xf32>
    %109 = arith.subf %107, %108 : vector<4x1xf32>
    %cst_36 = arith.constant 9.99999974E-6 : f32
    %110 = vector.broadcast %cst_36 : f32 to vector<4x1xf32>
    %111 = arith.addf %109, %110 : vector<4x1xf32>
    %112 = math.rsqrt %111 : vector<4x1xf32>
    %c0_37 = arith.constant 0 : index
    %c0_38 = arith.constant 0 : index
    %113 = vector.load %arg3[%c0_37, %c0_38] : memref<4x1xf32, #tpu.memory_space<vmem>>, vector<4x1xf32>
    %114 = arith.mulf %112, %113 : vector<4x1xf32>
    %115 = vector.broadcast %105 : vector<4x1xf32> to vector<4x512xf32>
    %116 = arith.subf %98, %115 : vector<4x512xf32>
    %117 = vector.broadcast %114 : vector<4x1xf32> to vector<4x512xf32>
    %118 = arith.mulf %116, %117 : vector<4x512xf32>
    %c0_39 = arith.constant 0 : index
    %c0_40 = arith.constant 0 : index
    %119 = vector.load %arg4[%c0_39, %c0_40] : memref<4x1xf32, #tpu.memory_space<vmem>>, vector<4x1xf32>
    %120 = vector.broadcast %119 : vector<4x1xf32> to vector<4x512xf32>
    %121 = arith.addf %118, %120 : vector<4x512xf32>
    %cst_41 = arith.constant 0.000000e+00 : f32
    %122 = vector.broadcast %cst_41 : f32 to vector<4x512xf32>
    %123 = arith.maximumf %121, %122 : vector<4x512xf32>
    %124 = vector.extract_strided_slice %123 {offsets = [0, 495], sizes = [4, 17], strides = [1, 1]} : vector<4x512xf32> to vector<4x17xf32>
    %125 = vector.extract_strided_slice %123 {offsets = [0, 0], sizes = [4, 495], strides = [1, 1]} : vector<4x512xf32> to vector<4x495xf32>
    %126 = tpu.concatenate %124, %125 in 1 : vector<4x17xf32>, vector<4x495xf32> -> vector<4x512xf32>
    %127 = vector.broadcast %9 : vector<1x512xf32> to vector<4x512xf32>
    %128 = arith.mulf %126, %127 : vector<4x512xf32>
    %129 = vector.extract_strided_slice %123 {offsets = [0, 496], sizes = [4, 16], strides = [1, 1]} : vector<4x512xf32> to vector<4x16xf32>
    %130 = vector.extract_strided_slice %123 {offsets = [0, 0], sizes = [4, 496], strides = [1, 1]} : vector<4x512xf32> to vector<4x496xf32>
    %131 = tpu.concatenate %129, %130 in 1 : vector<4x16xf32>, vector<4x496xf32> -> vector<4x512xf32>
    %132 = vector.broadcast %14 : vector<1x512xf32> to vector<4x512xf32>
    %133 = arith.mulf %131, %132 : vector<4x512xf32>
    %134 = vector.extract_strided_slice %123 {offsets = [0, 497], sizes = [4, 15], strides = [1, 1]} : vector<4x512xf32> to vector<4x15xf32>
    %135 = vector.extract_strided_slice %123 {offsets = [0, 0], sizes = [4, 497], strides = [1, 1]} : vector<4x512xf32> to vector<4x497xf32>
    %136 = tpu.concatenate %134, %135 in 1 : vector<4x15xf32>, vector<4x497xf32> -> vector<4x512xf32>
    %137 = vector.broadcast %22 : vector<1x512xf32> to vector<4x512xf32>
    %138 = arith.mulf %136, %137 : vector<4x512xf32>
    %139 = vector.extract_strided_slice %123 {offsets = [0, 511], sizes = [4, 1], strides = [1, 1]} : vector<4x512xf32> to vector<4x1xf32>
    %140 = vector.extract_strided_slice %123 {offsets = [0, 0], sizes = [4, 511], strides = [1, 1]} : vector<4x512xf32> to vector<4x511xf32>
    %141 = tpu.concatenate %139, %140 in 1 : vector<4x1xf32>, vector<4x511xf32> -> vector<4x512xf32>
    %142 = vector.broadcast %27 : vector<1x512xf32> to vector<4x512xf32>
    %143 = arith.mulf %141, %142 : vector<4x512xf32>
    %144 = vector.extract_strided_slice %123 {offsets = [0, 1], sizes = [4, 511], strides = [1, 1]} : vector<4x512xf32> to vector<4x511xf32>
    %145 = vector.extract_strided_slice %123 {offsets = [0, 0], sizes = [4, 1], strides = [1, 1]} : vector<4x512xf32> to vector<4x1xf32>
    %146 = tpu.concatenate %144, %145 in 1 : vector<4x511xf32>, vector<4x1xf32> -> vector<4x512xf32>
    %147 = vector.broadcast %32 : vector<1x512xf32> to vector<4x512xf32>
    %148 = arith.mulf %146, %147 : vector<4x512xf32>
    %149 = vector.extract_strided_slice %123 {offsets = [0, 15], sizes = [4, 497], strides = [1, 1]} : vector<4x512xf32> to vector<4x497xf32>
    %150 = vector.extract_strided_slice %123 {offsets = [0, 0], sizes = [4, 15], strides = [1, 1]} : vector<4x512xf32> to vector<4x15xf32>
    %151 = tpu.concatenate %149, %150 in 1 : vector<4x497xf32>, vector<4x15xf32> -> vector<4x512xf32>
    %152 = vector.broadcast %40 : vector<1x512xf32> to vector<4x512xf32>
    %153 = arith.mulf %151, %152 : vector<4x512xf32>
    %154 = vector.extract_strided_slice %123 {offsets = [0, 16], sizes = [4, 496], strides = [1, 1]} : vector<4x512xf32> to vector<4x496xf32>
    %155 = vector.extract_strided_slice %123 {offsets = [0, 0], sizes = [4, 16], strides = [1, 1]} : vector<4x512xf32> to vector<4x16xf32>
    %156 = tpu.concatenate %154, %155 in 1 : vector<4x496xf32>, vector<4x16xf32> -> vector<4x512xf32>
    %157 = vector.broadcast %45 : vector<1x512xf32> to vector<4x512xf32>
    %158 = arith.mulf %156, %157 : vector<4x512xf32>
    %159 = vector.extract_strided_slice %123 {offsets = [0, 17], sizes = [4, 495], strides = [1, 1]} : vector<4x512xf32> to vector<4x495xf32>
    %160 = vector.extract_strided_slice %123 {offsets = [0, 0], sizes = [4, 17], strides = [1, 1]} : vector<4x512xf32> to vector<4x17xf32>
    %161 = tpu.concatenate %159, %160 in 1 : vector<4x495xf32>, vector<4x17xf32> -> vector<4x512xf32>
    %162 = vector.broadcast %53 : vector<1x512xf32> to vector<4x512xf32>
    %163 = arith.mulf %161, %162 : vector<4x512xf32>
    %164 = tpu.concatenate %128, %133, %138, %143, %123, %148, %153, %158, %163 in 0 : vector<4x512xf32>, vector<4x512xf32>, vector<4x512xf32>, vector<4x512xf32>, vector<4x512xf32>, vector<4x512xf32>, vector<4x512xf32>, vector<4x512xf32>, vector<4x512xf32> -> vector<36x512xf32>
    %165 = arith.truncf %164 : vector<36x512xf32> to vector<36x512xbf16>
    %c0_42 = arith.constant 0 : index
    %c0_43 = arith.constant 0 : index
    %166 = vector.load %arg5[%c0_42, %c0_43] : memref<4x36xbf16, #tpu.memory_space<vmem>>, vector<4x36xbf16>
    %cst_44 = arith.constant dense<0.000000e+00> : vector<4x512xf32>
    %167 = tpu.matmul %166, %165, %cst_44 {dimension_numbers = #tpu.dot_dimension_numbers<[1], [0], [0], [1], [0, 0, 1, 1], [], []>} : vector<4x36xbf16>, vector<36x512xbf16>, vector<4x512xf32> -> vector<4x512xf32>
    %cst_45 = arith.constant dense<0.000000e+00> : vector<4xf32>
    %168 = vector.multi_reduction <add>, %167, %cst_45 [1] : vector<4x512xf32> to vector<4xf32>
    %169 = vector.shape_cast %168 : vector<4xf32> to vector<4x1xf32>
    %170 = arith.mulf %167, %167 : vector<4x512xf32>
    %cst_46 = arith.constant dense<0.000000e+00> : vector<4xf32>
    %171 = vector.multi_reduction <add>, %170, %cst_46 [1] : vector<4x512xf32> to vector<4xf32>
    %172 = vector.shape_cast %171 : vector<4xf32> to vector<4x1xf32>
    %cst_47 = arith.constant 0.001953125 : f32
    %173 = vector.broadcast %cst_47 : f32 to vector<4x1xf32>
    %174 = arith.mulf %169, %173 : vector<4x1xf32>
    %cst_48 = arith.constant 0.001953125 : f32
    %175 = vector.broadcast %cst_48 : f32 to vector<4x1xf32>
    %176 = arith.mulf %172, %175 : vector<4x1xf32>
    %177 = arith.mulf %174, %174 : vector<4x1xf32>
    %178 = arith.subf %176, %177 : vector<4x1xf32>
    %cst_49 = arith.constant 9.99999974E-6 : f32
    %179 = vector.broadcast %cst_49 : f32 to vector<4x1xf32>
    %180 = arith.addf %178, %179 : vector<4x1xf32>
    %181 = math.rsqrt %180 : vector<4x1xf32>
    %c0_50 = arith.constant 0 : index
    %c0_51 = arith.constant 0 : index
    %182 = vector.load %arg6[%c0_50, %c0_51] : memref<4x1xf32, #tpu.memory_space<vmem>>, vector<4x1xf32>
    %183 = arith.mulf %181, %182 : vector<4x1xf32>
    %184 = vector.broadcast %174 : vector<4x1xf32> to vector<4x512xf32>
    %185 = arith.subf %167, %184 : vector<4x512xf32>
    %186 = vector.broadcast %183 : vector<4x1xf32> to vector<4x512xf32>
    %187 = arith.mulf %185, %186 : vector<4x512xf32>
    %c0_52 = arith.constant 0 : index
    %c0_53 = arith.constant 0 : index
    %188 = vector.load %arg7[%c0_52, %c0_53] : memref<4x1xf32, #tpu.memory_space<vmem>>, vector<4x1xf32>
    %189 = vector.broadcast %188 : vector<4x1xf32> to vector<4x512xf32>
    %190 = arith.addf %187, %189 : vector<4x512xf32>
    %c0_54 = arith.constant 0 : index
    %c0_55 = arith.constant 0 : index
    %191 = vector.load %arg1[%c0_54, %c0_55] : memref<4x512xf32, #tpu.memory_space<vmem>>, vector<4x512xf32>
    %192 = arith.addf %190, %191 : vector<4x512xf32>
    %cst_56 = arith.constant 0.000000e+00 : f32
    %193 = vector.broadcast %cst_56 : f32 to vector<4x512xf32>
    %194 = arith.maximumf %192, %193 : vector<4x512xf32>
    %c0_57 = arith.constant 0 : index
    %c0_58 = arith.constant 0 : index
    %195 = vector.load %arg8[%c0_57, %c0_58] : memref<4x512xf32, #tpu.memory_space<vmem>>, vector<4x512xf32>
    tpu.vector_store %arg8[%c0_57, %c0_58], %194 {strides = array<i32>} : memref<4x512xf32, #tpu.memory_space<vmem>>, vector<4x512xf32>,
    return
  }
}

</mosaic_0001>

<bundles_post_ra>
// kernel: tpu_custom_call.1
= control target key start
LH: loop header
LB: loop body
LE: loop exit
PB: predicated region body
PF: predicated region fallthrough
CT: control target
= control target key end

     0   :  { %13 = vsyncpa [#allocation3], 0  ;;  %s1819_s0 = inlined_call_operand.hbm [shape: s32[2,512], index: 0, kind: input, shape index: {}]   ;;  %s1820_s1 = inlined_call_operand.vmem [shape: f32[4,512], index: 1, kind: input, shape index: {}]   ;;  %s1821_s2 = inlined_call_operand.vmem [shape: bf16[4,36], index: 2, kind: input, shape index: {}]   ;;  %s1822_s3 = inlined_call_operand.vmem [shape: f32[4,1], index: 3, kind: input, shape index: {}]   ;;  %s1823_s4 = inlined_call_operand.vmem [shape: f32[4,1], index: 4, kind: input, shape index: {}]   ;;  %s1824_s5 = inlined_call_operand.vmem [shape: bf16[4,36], index: 5, kind: input, shape index: {}]   ;;  %s1825_s6 = inlined_call_operand.vmem [shape: f32[4,1], index: 6, kind: input, shape index: {}]   ;;  %s1826_s7 = inlined_call_operand.vmem [shape: f32[4,1], index: 7, kind: input, shape index: {}]   ;;  %s1827_s8 = inlined_call_operand.hbm [shape: f32[4,512], index: 8, kind: output, shape index: {}]  }
   0x1   :  { %14 = vsyncpa [#allocation4], 0  ;;  %s1158_s27 = smov [#allocation2]   ;;  %s1110_s9 = scalar_lea.hbm %s1819_s0, 128 }
   0x2   :  { %s21_s28 = sshll.u32 %s1158_s27, 4  ;;  %p1111_p0 = scmp.ne.s32.totalorder %s1819_s0, %s1110_s9  ;;  %s22_s28 = int_to_ptr.vmem [resolvable:$true] %s21_s28 }
   0x3   :  { %p1114_p1 = scmp.lt.u32.totalorder %s1110_s9, %s1819_s0 }
   0x5   :  { %p1116_p2 = pnand %p1114_p1, %p1111_p0 }
   0x7   :  { %1119 = shalt.err (!%p1116_p2)
}
   0x8   :  { %s1120_s14 = scalar_lea.vmem %s22_s28, 128  ;;  %p1125_p4 = scmp.lt.s32.totalorder %s22_s28, %s22_s28 }
   0x9   :  { %p1121_p3 = scmp.ne.s32.totalorder %s22_s28, %s1120_s14  ;;  %p1126_p5 = scmp.lt.s32.totalorder %s1120_s14, %s1120_s14 }
   0xb   :  { %p1127_p6 = por %p1126_p5, %p1125_p4 }
   0xd   :  { %p1128_p7 = pnand %p1127_p6, %p1121_p3 }
   0xf   :  { %1131 = shalt.err (!%p1128_p7)
}
  0x10   :  { %24 = dma.hbm_to_vmem [thread:$0]  %s1819_s0, 128, %s22_s28, [#allocation3]  }
  0x11   :  { %1154 = dma.done.wait [#allocation3], 128  }
  0x12   :  { %1155 = vsyncadd [#allocation3], 4294967168  ;;  %v1230_v0 = vld [vmem:[%s1820_s1] sm:$0xff]  ;;  %s1159_s19 = smov 1   ;;  %s1160_s20 = smov 16   ;;  %v1243_v2 = vld [vmem:[%s1820_s1 + $0x8] sm:$0xff]  ;;  %v87_v5 = vlaneseq }
  0x13   :  { %200 = vrot.lane.b32.xlu1 %v1230_v0, %s1159_s19  ;;  %114 = vrot.lane.b32.xlu0 %v1230_v0, %s1160_s20  ;;  %v1238_v1 = vcombine.high %v1230_v0, %v1230_v0  ;;  %v1251_v3 = vcombine.high %v1243_v2, %v1243_v2  ;;  %s1161_s22 = smov 17   ;;  %s1162_s23 = smov 15   ;;  %v1166_v4 = vmov 0   ;;  %v1313_v8 = vld [vmem:[#allocation2 + $0x1] ss:$2 sm:$0xf] }
  0x14   :  { %s1163_s24 = smov 127   ;;  %s1164_s25 = smov 112   ;;  %541 = vmatprep.mubr.bf16.mxu0 %v1166_v4  ;;  %582 = vmatprep.mubr.bf16.mxu1 %v1166_v4  ;;  %v1315_v9 = vld [vmem:[#allocation2] ss:$2 sm:$0xf]  ;;  %v88_v10 = vshrl.u32 %v87_v5, 7 }
  0x15   :  { %s1165_s26 = smov 113   ;;  %1100 = vset.pattern.permute.xlu0 %v1166_v4  ;;  %1101 = vset.pattern.permute.xlu1 %v1166_v4  ;;  %s1167_s27 = smov 111   ;;  %vm47_vm0 = vcmp.ge.s32.totalorder %v1313_v8, 1  ;;  %vm46_vm1 = vcmp.ge.s32.totalorder %v1315_v9, 1  ;;  %vm51_vm2 = vcmp.lt.s32.totalorder %v1313_v8, 15  ;;  %v1168_v14 = vmov 0.0  }
  0x16   :  { %v1324_v13 = vsub.s32 1, %v88_v10  ;;  %vm48_vm3 = vmand %vm46_vm1, %vm47_vm0  ;;  %v54_v15 = vsel %vm47_vm0, 1.0, %v1168_v14  ;;  %v50_v16 = vsel %vm46_vm1, 1.0, %v1168_v14  ;;  %vm206_vm4 = vcmask 7168   ;;  %s1169_s16 = smov [#allocation5]  }
  0x17   :  { %202 = vrot.lane.b32.xlu1 %v1238_v1, %s1159_s19  ;;  %116 = vrot.lane.b32.xlu0 %v1238_v1, %s1160_s20  ;;  %vm120_vm5 = vcmask 130048   ;;  %vm52_vm6 = vmand %vm46_vm1, %vm51_vm2  ;;  %v1337_v19 = vsel %vm48_vm3, 1.0, %v1168_v14  ;;  %vm77_vm7 = vcmask 138240   ;;  %v1358_v28 = vsub.s32 0, %v88_v10  ;;  %s1071_s17 = sshll.u32 %s1169_s16, 4  ;;  %s1072_s17 = int_to_ptr.vmem [resolvable:$true] %s1071_s17 }
  0x18   :  { %v1340_v20 = vrot.slane %v54_v15, %v1324_v13  ;;  %v1343_v21 = vrot.slane %v50_v16, %v1324_v13  ;;  %v1350_v24 = vsel %vm52_vm6, 1.0, %v1168_v14  ;;  %v1356_v27 = vrot.slane %v1337_v19, %v1324_v13  ;;  %s1132_s18 = scalar_lea.vmem %s1072_s17, 256  ;;  %p1137_p9 = scmp.lt.s32.totalorder %s1072_s17, %s1072_s17 }
  0x19   :  { %vm163_vm8 = vcmask 121856   ;;  %v1366_v32 = vrot.slane %v1350_v24, %v1324_v13  ;;  %v1372_v36 = vrot.slane %v54_v15, %v1358_v28  ;;  %vm462_vm9 = vcmask 1043456   ;;  %p1133_p8 = scmp.ne.s32.totalorder %s1072_s17, %s1132_s18  ;;  %p1138_p10 = scmp.lt.s32.totalorder %s1132_s18, %s1132_s18 }
  0x1a   :  { %v1377_v40 = vrot.slane %v50_v16, %v1358_v28  ;;  %v1385_v46 = vrot.slane %v1337_v19, %v1358_v28  ;;  %v1394_v53 = vrot.slane %v1350_v24, %v1358_v28  ;;  %v1396_v54 = vsub.s32 2, %v88_v10 }
  0x1b   :  { %197 = vrot.lane.b32.xlu1 %v1251_v3, %s1159_s19  ;;  %111 = vrot.lane.b32.xlu0 %v1251_v3, %s1160_s20  ;;  %v1398_v55 = vsub.s32 3, %v88_v10  ;;  %vm56_vm10 = vcmp.lt.s32.totalorder %v1315_v9, 15  ;;  %vm248_vm11 = vcmask 1039360   ;;  %vm334_vm12 = vcmask 916480   ;;  %p1139_p11 = por %p1138_p10, %p1137_p9 }
  0x1c   :  { %v1404_v63 = vrot.slane %v50_v16, %v1396_v54  ;;  %vm57_vm13 = vmand %vm56_vm10, %vm47_vm0  ;;  %vm291_vm14 = vcmask 924672   ;;  %vm377_vm0 = vcmask 908288   ;;  %vm496_vm1 = vcmask 1041408  }
  0x1d   :  { %v1407_v5 = vrot.slane %v50_v16, %v1398_v55  ;;  %vm60_vm15 = vmand %vm56_vm10, %vm51_vm2  ;;  %p1140_p12 = pnand %p1139_p11, %p1133_p8 }
  0x1f   :  { %73 = vrot.lane.b32.xlu1 %v1238_v1, %s1161_s22  ;;  %71 = vrot.lane.b32.xlu0 %v1230_v0, %s1161_s22 }
  0x23   :  { %159 = vrot.lane.b32.xlu1 %v1238_v1, %s1162_s23  ;;  %157 = vrot.lane.b32.xlu0 %v1230_v0, %s1162_s23 }
  0x27   :  { %118 = vrot.lane.b32.xlu1 %v1243_v2, %s1160_s20  ;;  %66 = vrot.lane.b32.xlu0 %v1251_v3, %s1161_s22 }
  0x2b   :  { %204 = vrot.lane.b32.xlu1 %v1243_v2, %s1159_s19  ;;  %154 = vrot.lane.b32.xlu0 %v1251_v3, %s1162_s23 }
  0x2f   :  { %244 = vrot.lane.b32.xlu1 %v1243_v2, %s1163_s24  ;;  %242 = vrot.lane.b32.xlu0 %v1238_v1, %s1163_s24 }
  0x33   :  { %330 = vrot.lane.b32.xlu1 %v1243_v2, %s1164_s25  ;;  %328 = vrot.lane.b32.xlu0 %v1238_v1, %s1164_s25 }
  0x37   :  { %161 = vrot.lane.b32.xlu1 %v1243_v2, %s1162_s23  ;;  %75 = vrot.lane.b32.xlu0 %v1243_v2, %s1161_s22 }
  0x3b   :  { %326 = vrot.lane.b32.xlu1 %v1230_v0, %s1164_s25  ;;  %240 = vrot.lane.b32.xlu0 %v1230_v0, %s1163_s24 }
  0x3f   :  { %287 = vrot.lane.b32.xlu1 %v1243_v2, %s1165_s26  ;;  %285 = vrot.lane.b32.xlu0 %v1238_v1, %s1165_s26 }
  0x43   :  { %283 = vrot.lane.b32.xlu1 %v1230_v0, %s1165_s26  ;;  %246 = vrot.lane.b32.xlu0 %v1251_v3, %s1163_s24 }
  0x47   :  { %289 = vrot.lane.b32.xlu1 %v1251_v3, %s1165_s26  ;;  %332 = vrot.lane.b32.xlu0 %v1251_v3, %s1164_s25 }
  0x4b   :  { %371 = vrot.lane.b32.xlu1 %v1238_v1, %s1167_s27  ;;  %369 = vrot.lane.b32.xlu0 %v1230_v0, %s1167_s27 }
  0x4f   :  { %375 = vrot.lane.b32.xlu1 %v1251_v3, %s1167_s27  ;;  %373 = vrot.lane.b32.xlu0 %v1243_v2, %s1167_s27 }
  0x85   :  { %v201_v6 = vpop.permute.xlu1 %200  ;;  %v115_v7 = vpop.permute.xlu0 %114 }
  0x89   :  { %v1317_v11 = vpop.permute.xlu1 %202  ;;  %v1320_v12 = vpop.permute.xlu0 %116 }
  0x8a   :  { %v207_v22 = vsel %vm206_vm4, %v201_v6, %v1317_v11  ;;  %v121_v23 = vsel %vm120_vm5, %v115_v7, %v1320_v12 }
  0x8b   :  { %v237_v30 = vmul.f32 %v1340_v20, %v207_v22  ;;  %v151_v31 = vmul.f32 %v1343_v21, %v121_v23 }
  0x8d   :  { %v1332_v17 = vpop.permute.xlu1 %197  ;;  %v112_v18 = vpop.permute.xlu0 %111  ;;  %v429_v38 = vrot.slane %v237_v30, 4  ;;  %v417_v39 = vrot.slane %v151_v31, 4 }
  0x8e   :  { %v214_v42 = vsel %vm206_vm4, %v1332_v17, %v201_v6  ;;  %v128_v43 = vsel %vm120_vm5, %v112_v18, %v115_v7  ;;  %v1410_v6 = vrot.slane %v54_v15, %v1396_v54  ;;  %v1413_v7 = vrot.slane %v54_v15, %v1398_v55 }
  0x8f   :  { %v236_v51 = vmul.f32 %v1372_v36, %v214_v42  ;;  %v150_v52 = vmul.f32 %v1377_v40, %v128_v43  ;;  %v1451_v42 = vrot.slane %v1337_v19, %v1396_v54  ;;  %v1455_v43 = vrot.slane %v1337_v19, %v1398_v55 }
  0x91   :  { %v1352_v25 = vpop.permute.xlu1 %73  ;;  %v72_v26 = vpop.permute.xlu0 %71  ;;  %v428_v60 = vrot.slane %v236_v51, 4  ;;  %v416_v61 = vrot.slane %v150_v52, 4 }
  0x92   :  { %v78_v29 = vsel %vm77_vm7, %v72_v26, %v1352_v25 }
  0x93   :  { %v108_v33 = vmul.f32 %v1356_v27, %v78_v29 }
  0x95   :  { %v1369_v34 = vpop.permute.xlu1 %159  ;;  %v158_v35 = vpop.permute.xlu0 %157  ;;  %v464_v47 = vsel %vm462_vm9, %v108_v33, %v417_v39  ;;  %v1431_v33 = vsel %vm51_vm2, 1.0, %v1168_v14  ;;  %v1443_v39 = vrot.slane %v1350_v24, %v1396_v54  ;;  %vm492_vm2 = vcmask 293888  }
  0x96   :  { %v164_v37 = vsel %vm163_vm8, %v158_v35, %v1369_v34 }
  0x97   :  { %v194_v41 = vmul.f32 %v1366_v32, %v164_v37 }
  0x99   :  { %v119_v44 = vpop.permute.xlu1 %118  ;;  %v67_v45 = vpop.permute.xlu0 %66  ;;  %v468_v48 = vsel %vm462_vm9, %v194_v41, %v429_v38  ;;  %v1447_v41 = vrot.slane %v1350_v24, %v1398_v55 }
  0x9a   :  { %v85_v49 = vsel %vm77_vm7, %v67_v45, %v72_v26  ;;  %v480_v50 = vpack.c.bf16 %v468_v48, %v464_v47  ;;  %v122_v10 = vsel %vm120_vm5, %v1320_v12, %v119_v44  ;;  %v123_v16 = vsel %vm120_vm5, %v119_v44, %v112_v18 }
  0x9b   :  { %v107_v56 = vmul.f32 %v1385_v46, %v85_v49  ;;  %v152_v12 = vmul.f32 %v1404_v63, %v122_v10  ;;  %v1459_v47 = vrot.slane %v1431_v33, %v1324_v13 }
  0x9c   :  { %509 = vmatprep.subr.bf16.mxu0 %v480_v50 }
  0x9d   :  { %v205_v57 = vpop.permute.xlu1 %204  ;;  %v155_v58 = vpop.permute.xlu0 %154  ;;  %v463_v26 = vsel %vm462_vm9, %v107_v56, %v416_v61  ;;  %v418_v44 = vrot.slane %v152_v12, 4 }
  0x9e   :  { %v171_v59 = vsel %vm163_vm8, %v155_v58, %v158_v35  ;;  %v208_v30 = vsel %vm206_vm4, %v1317_v11, %v205_v57  ;;  %v209_v15 = vsel %vm206_vm4, %v205_v57, %v1332_v17  ;;  %v153_v35 = vmul.f32 %v1407_v5, %v123_v16 }
  0x9f   :  { %v193_v62 = vmul.f32 %v1394_v53, %v171_v59  ;;  %v238_v37 = vmul.f32 %v1410_v6, %v208_v30  ;;  %v239_v18 = vmul.f32 %v1413_v7, %v209_v15  ;;  %v59_v17 = vsel %vm56_vm10, 1.0, %v1168_v14 }
  0xa0   :  { %v1462_v48 = vrot.slane %v59_v17, %v1324_v13  ;;  %v419_v49 = vrot.slane %v153_v35, 4 }
  0xa1   :  { %v1417_v22 = vpop.permute.xlu1 %244  ;;  %v243_v23 = vpop.permute.xlu0 %242  ;;  %v467_v29 = vsel %vm462_vm9, %v193_v62, %v428_v60  ;;  %v430_v24 = vrot.slane %v238_v37, 4  ;;  %v431_v50 = vrot.slane %v239_v18, 4 }
  0xa2   :  { %v479_v31 = vpack.c.bf16 %v467_v29, %v463_v26  ;;  %v250_v51 = vsel %vm248_vm11, %v243_v23, %v1417_v22 }
  0xa3   :  { %v280_v29 = vmul.f32 %v1459_v47, %v250_v51 }
  0xa4   :  { %510 = vmatpush1.bf16.msra.mxu0 %v479_v31 }
  0xa5   :  { %v1436_v38 = vpop.permute.xlu1 %330  ;;  %v329_v11 = vpop.permute.xlu0 %328 }
  0xa9   :  { %v162_v52 = vpop.permute.xlu1 %161  ;;  %v76_v56 = vpop.permute.xlu0 %75 }
  0xaa   :  { %v165_v19 = vsel %vm163_vm8, %v1369_v34, %v162_v52  ;;  %v166_v57 = vsel %vm163_vm8, %v162_v52, %v155_v58  ;;  %v79_v59 = vsel %vm77_vm7, %v1352_v25, %v76_v56  ;;  %v80_v60 = vsel %vm77_vm7, %v76_v56, %v67_v45 }
  0xab   :  { %v195_v61 = vmul.f32 %v1443_v39, %v165_v19  ;;  %v196_v62 = vmul.f32 %v1447_v41, %v166_v57  ;;  %v109_v10 = vmul.f32 %v1451_v42, %v79_v59  ;;  %v110_v26 = vmul.f32 %v1455_v43, %v80_v60 }
  0xac   :  { %v336_v34 = vsel %vm334_vm12, %v329_v11, %v1436_v38  ;;  %v1484_v58 = vrot.slane %v59_v17, %v1358_v28  ;;  %v58_v25 = vsel %vm57_vm13, 1.0, %v1168_v14  ;;  %v1495_v52 = vrot.slane %v1431_v33, %v1358_v28 }
  0xad   :  { %v327_v16 = vpop.permute.xlu1 %326  ;;  %v241_v45 = vpop.permute.xlu0 %240  ;;  %v466_v30 = vsel %vm462_vm9, %v110_v26, %v419_v49  ;;  %v470_v15 = vsel %vm462_vm9, %v196_v62, %v431_v50  ;;  %v465_v31 = vsel %vm462_vm9, %v109_v10, %v418_v44  ;;  %v469_v12 = vsel %vm462_vm9, %v195_v61, %v430_v24 }
  0xae   :  { %v335_v35 = vsel %vm334_vm12, %v327_v16, %v329_v11  ;;  %v482_v37 = vpack.c.bf16 %v470_v15, %v466_v30  ;;  %v481_v18 = vpack.c.bf16 %v469_v12, %v465_v31  ;;  %v366_v51 = vmul.f32 %v1462_v48, %v336_v34 }
  0xaf   :  { %v1498_v56 = vrot.slane %v58_v25, %v1324_v13  ;;  %v249_v49 = vsel %vm248_vm11, %v241_v45, %v243_v23  ;;  %v443_v44 = vrot.slane %v280_v29, 4  ;;  %v365_v24 = vmul.f32 %v1484_v58, %v335_v35 }
  0xb0   :  { %550 = vmatprep.subr.bf16.mxu1 %v482_v37  ;;  %v1504_v57 = vrot.slane %v58_v25, %v1358_v28  ;;  %v1508_v59 = vrot.slane %v1431_v33, %v1396_v54  ;;  %v455_v23 = vrot.slane %v366_v51, 4  ;;  %v279_v60 = vmul.f32 %v1495_v52, %v249_v49 }
  0xb1   :  { %v288_v50 = vpop.permute.xlu1 %287  ;;  %v286_v11 = vpop.permute.xlu0 %285  ;;  %551 = vmatpush1.bf16.msra.mxu1 %v481_v18  ;;  %v1518_v62 = vrot.slane %v1431_v33, %v1398_v55  ;;  %v1521_v10 = vrot.slane %v59_v17, %v1396_v54  ;;  %v1524_v26 = vrot.slane %v59_v17, %v1398_v55  ;;  %v454_v29 = vrot.slane %v365_v24, 4 }
  0xb2   :  { %v293_v19 = vsel %vm291_vm14, %v286_v11, %v288_v50  ;;  %v472_v9 = vsel %vm462_vm9, %v1238_v1, %v443_v44  ;;  %v61_v15 = vsel %vm60_vm15, 1.0, %v1168_v14  ;;  %v442_v17 = vrot.slane %v279_v60, 4 }
  0xb3   :  { %v323_v61 = vmul.f32 %v1498_v56, %v293_v19  ;;  %v1538_v49 = vrot.slane %v58_v25, %v1396_v54  ;;  %v1541_v14 = vrot.slane %v58_v25, %v1398_v55 }
  0xb5   :  { %v284_v8 = vpop.permute.xlu1 %283  ;;  %v247_v34 = vpop.permute.xlu0 %246  ;;  %v476_v30 = vsel %vm462_vm9, %v323_v61, %v455_v23 }
  0xb6   :  { %v292_v31 = vsel %vm291_vm14, %v284_v8, %v286_v11  ;;  %v251_v33 = vsel %vm248_vm11, %v1417_v22, %v247_v34  ;;  %v257_v12 = vsel %vm248_vm11, %v247_v34, %v241_v45  ;;  %v484_v35 = vpack.c.bf16 %v476_v30, %v472_v9 }
  0xb7   :  { %v322_v37 = vmul.f32 %v1504_v57, %v292_v31  ;;  %v281_v18 = vmul.f32 %v1508_v59, %v251_v33  ;;  %v282_v51 = vmul.f32 %v1518_v62, %v257_v12  ;;  %v1545_v11 = vrot.slane %v61_v15, %v1358_v28 }
  0xb8   :  { %511 = vmatprep.subr.bf16.mxu0 %v484_v35  ;;  %v1557_v28 = vrot.slane %v61_v15, %v1398_v55  ;;  %v1563_v35 = vrot.slane %v61_v15, %v1324_v13 }
  0xb9   :  { %v445_v44 = vrot.slane %v282_v51, 4  ;;  %v290_v24 = vpop.permute.xlu1 %289  ;;  %v333_v22 = vpop.permute.xlu0 %332  ;;  %v475_v45 = vsel %vm462_vm9, %v322_v37, %v454_v29  ;;  %v444_v25 = vrot.slane %v281_v18, 4  ;;  %v471_v29 = vsel %vm462_vm9, %v1230_v0, %v442_v17 }
  0xba   :  { %v294_v19 = vsel %vm291_vm14, %v288_v50, %v290_v24  ;;  %v300_v23 = vsel %vm291_vm14, %v290_v24, %v284_v8  ;;  %v337_v60 = vsel %vm334_vm12, %v1436_v38, %v333_v22  ;;  %v343_v61 = vsel %vm334_vm12, %v333_v22, %v327_v16 }
  0xbb   :  { %v367_v34 = vmul.f32 %v1521_v10, %v337_v60  ;;  %v368_v9 = vmul.f32 %v1524_v26, %v343_v61  ;;  %v483_v30 = vpack.c.bf16 %v475_v45, %v471_v29  ;;  %v324_v50 = vmul.f32 %v1538_v49, %v294_v19 }
  0xbc   :  { %v325_v8 = vmul.f32 %v1541_v14, %v300_v23  ;;  %v1566_v0 = vrot.slane %v61_v15, %v1396_v54  ;;  %v474_v55 = vsel %vm462_vm9, %v1251_v3, %v445_v44  ;;  %v473_v18 = vsel %vm462_vm9, %v1243_v2, %v444_v25 }
  0xbd   :  { %v456_v31 = vrot.slane %v367_v34, 4  ;;  %v457_v38 = vrot.slane %v368_v9, 4  ;;  %v372_v33 = vpop.permute.xlu1 %371  ;;  %v370_v16 = vpop.permute.xlu0 %369  ;;  %512 = vmatpush1.bf16.msra.mxu0 %v483_v30  ;;  %v491_v30 = vld [vmem:[%s1821_s2] sm:$0x3] }
  0xbe   :  { %v378_v12 = vsel %vm377_vm0, %v370_v16, %v372_v33 }
  0xbf   :  { %v408_v17 = vmul.f32 %v1545_v11, %v378_v12  ;;  %v478_v37 = vsel %vm462_vm9, %v325_v8, %v457_v38  ;;  %v477_v51 = vsel %vm462_vm9, %v324_v50, %v456_v31 }
  0xc0   :  { %v486_v24 = vpack.c.bf16 %v478_v37, %v474_v55  ;;  %v485_v22 = vpack.c.bf16 %v477_v51, %v473_v18 }
  0xc1   :  { %v376_v45 = vpop.permute.xlu1 %375  ;;  %v374_v13 = vpop.permute.xlu0 %373  ;;  %v487_v44 = vpack.c.bf16 %v408_v17, %v408_v17 }
  0xc2   :  { %v386_v19 = vsel %vm377_vm0, %v376_v45, %v370_v16  ;;  %v379_v54 = vsel %vm377_vm0, %v372_v33, %v374_v13  ;;  %v380_v15 = vsel %vm377_vm0, %v374_v13, %v376_v45  ;;  %552 = vmatprep.subr.bf16.mxu1 %v486_v24 }
  0xc3   :  { %v411_v23 = vmul.f32 %v1557_v28, %v386_v19  ;;  %v409_v60 = vmul.f32 %v1563_v35, %v379_v54  ;;  %v410_v2 = vmul.f32 %v1566_v0, %v380_v15  ;;  %553 = vmatpush1.bf16.msra.mxu1 %v485_v22  ;;  %v498_v9 = vsel %vm496_vm1, %v487_v44, 0 }
  0xc5   :  { %v490_v61 = vpack.c.bf16 %v411_v23, %v411_v23  ;;  %v488_v25 = vpack.c.bf16 %v409_v60, %v409_v60  ;;  %v489_v34 = vpack.c.bf16 %v410_v2, %v410_v2 }
  0xc7   :  { %1080 = vmatprep.subr.msk.bf16.mxu0 %vm496_vm1, %v488_v25  ;;  %1082 = vmatprep.subr.msk.bf16.mxu1 %vm496_vm1, %v490_v61  ;;  %v504_v29 = vsel %vm496_vm1, %v489_v34, 0  ;;  %v634_v34 = vld [vmem:[%s1823_s4] sm:$0xf] }
  0xc8   :  { %514 = vmatpush1.bf16.msra.mxu0 %v498_v9  ;;  %555 = vmatpush1.bf16.msra.mxu1 %v504_v29 }
  0xcb   :  { %1081 = vmatmul.mubr.msk.bf16.vlgmr.msra.gmra.mrb[0].mxu0 %vm492_vm2, %v491_v30  ;;  %1083 = vmatmul.mubr.msk.bf16.vlgmr.msra.gmra.mrb[0].mxu1 %vm492_vm2, %v491_v30 }
  0xcc   :  { %944 = vmatprep.mubr.bf16.mxu0 %v1166_v4  ;;  %985 = vmatprep.mubr.bf16.mxu1 %v1166_v4 }
 0x19e   :  { %v543_v50 = vpop.f32.mrb[0].mxu0  ;;  %v1592_v8 = vpop.f32.mrb[0].mxu1 }
 0x19f   :  { %v591_v31 = vsel %vm462_vm9, %v543_v50, 0.0  ;;  %v600_v38 = vmul.f32 %v543_v50, %v543_v50  ;;  %v602_v33 = vmul.f32 %v1592_v8, %v1592_v8  ;;  %v545_v16 = vpop.f32.mrb[1].mxu0  ;;  %v586_v12 = vpop.f32.mrb[1].mxu1  ;;  %v594_v55 = vsel %vm462_vm9, %v1592_v8, 0.0 }
 0x1a0   :  { %v592_v17 = vsel %vm462_vm9, %v545_v16, 0.0  ;;  %v601_v37 = vmul.f32 %v545_v16, %v545_v16  ;;  %v547_v18 = vpop.f32.mrb[2].mxu0  ;;  %v588_v51 = vpop.f32.mrb[2].mxu1  ;;  %v603_v19 = vmul.f32 %v586_v12, %v586_v12  ;;  %v596_v23 = vsel %vm462_vm9, %v586_v12, 0.0 }
 0x1a1   :  { %v604_v4 = vsel %vm462_vm9, %v600_v38, 0.0  ;;  %v593_v24 = vadd.f32 %v592_v17, %v591_v31  ;;  %v548_v22 = vpop.f32.mrb[3].mxu0  ;;  %v589_v45 = vpop.f32.mrb[3].mxu1  ;;  %v607_v54 = vsel %vm462_vm9, %v602_v33, 0.0 }
 0x1a2   :  { %v605_v13 = vsel %vm462_vm9, %v601_v37, 0.0  ;;  %v609_v61 = vsel %vm462_vm9, %v603_v19, 0.0 }
 0x1a3   :  { %v595_v15 = vadd.f32 %v594_v55, %v593_v24  ;;  %v606_v44 = vadd.f32 %v605_v13, %v604_v4  ;;  %v619_v4 = vld [vmem:[%s1822_s3] sm:$0xf] }
 0x1a5   :  { %v597_v60 = vadd.f32 %v596_v23, %v595_v15  ;;  %v608_v2 = vadd.f32 %v607_v54, %v606_v44 }
 0x1a7   :  { %598 = vadd.xlane.f32.xlu0 %v597_v60  ;;  %v610_v25 = vadd.f32 %v609_v61, %v608_v2 }
 0x1a9   :  { %611 = vadd.xlane.f32.xlu1 %v610_v25 }
 0x1ba   :  { %637 = vperm.xlu1 %1101, %v634_v34  }
 0x234   :  { %v599_v9 = vpop.xlane.xlu0 %598 }
 0x235   :  { %v613_v29 = vmul.f32 0.001953125, %v599_v9 }
 0x236   :  { %v612_v30 = vpop.xlane.xlu1 %611 }
 0x237   :  { %v614_v31 = vmul.f32 0.001953125, %v612_v30  ;;  %v615_v38 = vmul.f32 %v613_v29, %v613_v29  ;;  %v621_v33 = vsub.f32 %v543_v50, %v613_v29  ;;  %v622_v55 = vsub.f32 %v545_v16, %v613_v29 }
 0x238   :  { %v623_v17 = vsub.f32 %v1592_v8, %v613_v29  ;;  %v624_v37 = vsub.f32 %v586_v12, %v613_v29 }
 0x239   :  { %v616_v18 = vsub.f32 %v614_v31, %v615_v38 }
 0x23a   :  { %v638_v13 = vpop.permute.xlu1 %637 }
 0x23b   :  { %v617_v51 = vadd.f32 1e-05, %v616_v18 }
 0x23d   :  { %1104 = vrsqrt.f32 %v617_v51 }
 0x247   :  { %v1105_v24 = vpop.eup %1104 }
 0x248   :  { %v620_v22 = vmul.f32 %v1105_v24, %v619_v4 }
 0x24a   :  { %627 = vperm.xlu0 %1100, %v620_v22  }
 0x2c9   :  { %v628_v45 = vpop.permute.xlu0 %627 }
 0x2ca   :  { %v630_v19 = vmul.f32 %v628_v45, %v621_v33  ;;  %v631_v54 = vmul.f32 %v628_v45, %v622_v55  ;;  %v633_v50 = vmul.f32 %v628_v45, %v624_v37  ;;  %v632_v60 = vmul.f32 %v628_v45, %v623_v17 }
 0x2cc   :  { %v640_v15 = vadd.f32 %v638_v13, %v630_v19  ;;  %v641_v16 = vadd.f32 %v638_v13, %v631_v54  ;;  %v643_v8 = vadd.f32 %v638_v13, %v633_v50  ;;  %v642_v2 = vadd.f32 %v638_v13, %v632_v60 }
 0x2ce   :  { %v1612_v44 = vmax.f32 %v640_v15, 0.0  ;;  %v1618_v12 = vmax.f32 %v641_v16, 0.0  ;;  %v1624_v23 = vmax.f32 %v643_v8, 0.0  ;;  %v1642_v61 = vmax.f32 %v642_v2, 0.0 }
 0x2d0   :  { %655 = vrot.lane.b32.xlu0 %v1612_v44, %s1161_s22  ;;  %676 = vrot.lane.b32.xlu1 %v1612_v44, %s1160_s20 }
 0x2d4   :  { %697 = vrot.lane.b32.xlu0 %v1612_v44, %s1162_s23  ;;  %678 = vrot.lane.b32.xlu1 %v1618_v12, %s1160_s20 }
 0x2d8   :  { %649 = vrot.lane.b32.xlu0 %v1624_v23, %s1161_s22  ;;  %718 = vrot.lane.b32.xlu1 %v1612_v44, %s1159_s19 }
 0x2dc   :  { %694 = vrot.lane.b32.xlu0 %v1624_v23, %s1162_s23  ;;  %720 = vrot.lane.b32.xlu1 %v1618_v12, %s1159_s19 }
 0x2e0   :  { %738 = vrot.lane.b32.xlu0 %v1618_v12, %s1163_s24  ;;  %673 = vrot.lane.b32.xlu1 %v1624_v23, %s1160_s20 }
 0x2e4   :  { %780 = vrot.lane.b32.xlu0 %v1618_v12, %s1164_s25  ;;  %715 = vrot.lane.b32.xlu1 %v1624_v23, %s1159_s19 }
 0x2e8   :  { %659 = vrot.lane.b32.xlu0 %v1642_v61, %s1161_s22  ;;  %657 = vrot.lane.b32.xlu1 %v1618_v12, %s1161_s22 }
 0x2ec   :  { %736 = vrot.lane.b32.xlu0 %v1612_v44, %s1163_s24  ;;  %699 = vrot.lane.b32.xlu1 %v1618_v12, %s1162_s23 }
 0x2f0   :  { %759 = vrot.lane.b32.xlu0 %v1618_v12, %s1165_s26  ;;  %680 = vrot.lane.b32.xlu1 %v1642_v61, %s1160_s20 }
 0x2f4   :  { %742 = vrot.lane.b32.xlu0 %v1624_v23, %s1163_s24  ;;  %722 = vrot.lane.b32.xlu1 %v1642_v61, %s1159_s19 }
 0x2f8   :  { %784 = vrot.lane.b32.xlu0 %v1624_v23, %s1164_s25  ;;  %740 = vrot.lane.b32.xlu1 %v1642_v61, %s1163_s24 }
 0x2fc   :  { %799 = vrot.lane.b32.xlu0 %v1612_v44, %s1167_s27  ;;  %782 = vrot.lane.b32.xlu1 %v1642_v61, %s1164_s25 }
 0x300   :  { %803 = vrot.lane.b32.xlu0 %v1642_v61, %s1167_s27  ;;  %701 = vrot.lane.b32.xlu1 %v1642_v61, %s1162_s23 }
 0x304   :  { %778 = vrot.lane.b32.xlu1 %v1612_v44, %s1164_s25 }
 0x308   :  { %761 = vrot.lane.b32.xlu1 %v1642_v61, %s1165_s26 }
 0x30c   :  { %757 = vrot.lane.b32.xlu1 %v1612_v44, %s1165_s26 }
 0x310   :  { %763 = vrot.lane.b32.xlu1 %v1624_v23, %s1165_s26 }
 0x314   :  { %801 = vrot.lane.b32.xlu1 %v1618_v12, %s1167_s27 }
 0x318   :  { %805 = vrot.lane.b32.xlu1 %v1624_v23, %s1167_s27 }
 0x342   :  { %v656_v25 = vpop.permute.xlu0 %655  ;;  %v677_v34 = vpop.permute.xlu1 %676 }
 0x346   :  { %v698_v9 = vpop.permute.xlu0 %697  ;;  %v679_v29 = vpop.permute.xlu1 %678 }
 0x347   :  { %v682_v4 = vsel %vm120_vm5, %v677_v34, %v679_v29 }
 0x348   :  { %v691_v54 = vmul.f32 %v682_v4, %v1343_v21 }
 0x34a   :  { %v650_v30 = vpop.permute.xlu0 %649  ;;  %v719_v31 = vpop.permute.xlu1 %718 }
 0x34b   :  { %v668_v60 = vsel %vm77_vm7, %v650_v30, %v656_v25 }
 0x34c   :  { %v669_v4 = vmul.f32 %v668_v60, %v1385_v46 }
 0x34e   :  { %v721_v38 = vpop.permute.xlu1 %720  ;;  %v695_v33 = vpop.permute.xlu0 %694 }
 0x34f   :  { %v724_v24 = vsel %vm206_vm4, %v719_v31, %v721_v38  ;;  %v710_v15 = vsel %vm163_vm8, %v695_v33, %v698_v9 }
 0x350   :  { %v733_v50 = vmul.f32 %v724_v24, %v1340_v20 }
 0x352   :  { %v674_v55 = vpop.permute.xlu1 %673  ;;  %v1684_v17 = vpop.permute.xlu0 %738 }
 0x353   :  { %v689_v51 = vsel %vm120_vm5, %v674_v55, %v677_v34 }
 0x354   :  { %v690_v13 = vmul.f32 %v689_v51, %v1377_v40  ;;  %v837_v51 = vrot.slane %v733_v50, 4 }
 0x356   :  { %v716_v37 = vpop.permute.xlu1 %715  ;;  %v1696_v16 = vpop.permute.xlu0 %780 }
 0x357   :  { %v731_v18 = vsel %vm206_vm4, %v716_v37, %v719_v31  ;;  %v824_v31 = vrot.slane %v690_v13, 4 }
 0x358   :  { %v732_v22 = vmul.f32 %v731_v18, %v1372_v36  ;;  %v711_v36 = vmul.f32 %v710_v15, %v1394_v53  ;;  %v825_v18 = vrot.slane %v691_v54, 4 }
 0x35a   :  { %v658_v45 = vpop.permute.xlu1 %657  ;;  %v836_v8 = vrot.slane %v732_v22, 4  ;;  %v660_v24 = vpop.permute.xlu0 %659 }
 0x35b   :  { %v661_v19 = vsel %vm77_vm7, %v656_v25, %v658_v45 }
 0x35c   :  { %v670_v2 = vmul.f32 %v661_v19, %v1356_v27  ;;  %v872_v20 = vsel %vm462_vm9, %v711_v36, %v836_v8  ;;  %v868_v19 = vsel %vm462_vm9, %v669_v4, %v824_v31 }
 0x35d   :  { %v884_v13 = vpack.c.bf16 %v872_v20, %v868_v19 }
 0x35e   :  { %v700_v34 = vpop.permute.xlu1 %699  ;;  %v869_v25 = vsel %vm462_vm9, %v670_v2, %v825_v18  ;;  %v737_v54 = vpop.permute.xlu0 %736  ;;  %v662_v18 = vsel %vm77_vm7, %v658_v45, %v660_v24 }
 0x35f   :  { %v703_v40 = vsel %vm163_vm8, %v698_v9, %v700_v34 }
 0x360   :  { %v712_v21 = vmul.f32 %v703_v40, %v1366_v32  ;;  %v663_v40 = vsel %vm77_vm7, %v660_v24, %v650_v30 }
 0x362   :  { %v681_v22 = vpop.permute.xlu1 %680  ;;  %v873_v27 = vsel %vm462_vm9, %v712_v21, %v837_v51  ;;  %v760_v2 = vpop.permute.xlu0 %759 }
 0x363   :  { %v885_v53 = vpack.c.bf16 %v873_v27, %v869_v25  ;;  %v683_v32 = vsel %vm120_vm5, %v679_v29, %v681_v22  ;;  %v684_v46 = vsel %vm120_vm5, %v681_v22, %v674_v55  ;;  %v672_v55 = vmul.f32 %v663_v40, %v1455_v43 }
 0x364   :  { %v692_v50 = vmul.f32 %v683_v32, %v1404_v63  ;;  %v693_v36 = vmul.f32 %v684_v46, %v1407_v5  ;;  %v744_v43 = vsel %vm248_vm11, %v737_v54, %v1684_v17 }
 0x365   :  { %912 = vmatprep.subr.bf16.mxu0 %v885_v53 }
 0x366   :  { %913 = vmatpush1.bf16.msra.mxu0 %v884_v13  ;;  %v723_v9 = vpop.permute.xlu1 %722  ;;  %v826_v21 = vrot.slane %v692_v50, 4  ;;  %v827_v63 = vrot.slane %v693_v36, 4  ;;  %v743_v20 = vpop.permute.xlu0 %742 }
 0x367   :  { %v725_v8 = vsel %vm206_vm4, %v721_v38, %v723_v9  ;;  %v726_v60 = vsel %vm206_vm4, %v723_v9, %v716_v37  ;;  %v671_v38 = vmul.f32 %v662_v18, %v1451_v42  ;;  %v752_v46 = vsel %vm248_vm11, %v743_v20, %v737_v54 }
 0x368   :  { %v734_v51 = vmul.f32 %v725_v8, %v1410_v6  ;;  %v735_v29 = vmul.f32 %v726_v60, %v1413_v7  ;;  %v871_v27 = vsel %vm462_vm9, %v672_v55, %v827_v63  ;;  %v756_v18 = vmul.f32 %v752_v46, %v1518_v62 }
 0x369   :  { %v870_v22 = vsel %vm462_vm9, %v671_v38, %v826_v21 }
 0x36a   :  { %v741_v15 = vpop.permute.xlu1 %740  ;;  %v838_v45 = vrot.slane %v734_v51, 4  ;;  %v839_v24 = vrot.slane %v735_v29, 4  ;;  %v785_v9 = vpop.permute.xlu0 %784  ;;  %v851_v62 = vrot.slane %v756_v18, 4 }
 0x36b   :  { %v745_v37 = vsel %vm248_vm11, %v1684_v17, %v741_v15  ;;  %v753_v17 = vmul.f32 %v744_v43, %v1495_v52  ;;  %v746_v50 = vsel %vm248_vm11, %v741_v15, %v743_v20 }
 0x36c   :  { %v754_v25 = vmul.f32 %v745_v37, %v1459_v47  ;;  %v755_v51 = vmul.f32 %v746_v50, %v1508_v59 }
 0x36d   :  { %v848_v52 = vrot.slane %v753_v17, 4 }
 0x36e   :  { %v783_v31 = vpop.permute.xlu1 %782  ;;  %v849_v32 = vrot.slane %v754_v25, 4  ;;  %v800_v55 = vpop.permute.xlu0 %799  ;;  %v850_v38 = vrot.slane %v755_v51, 4 }
 0x36f   :  { %v787_v42 = vsel %vm334_vm12, %v1696_v16, %v783_v31  ;;  %v788_v40 = vsel %vm334_vm12, %v783_v31, %v785_v9  ;;  %v876_v59 = vsel %vm462_vm9, %v1612_v44, %v848_v52 }
 0x370   :  { %v877_v54 = vsel %vm462_vm9, %v1618_v12, %v849_v32  ;;  %v878_v44 = vsel %vm462_vm9, %v1642_v61, %v850_v38 }
 0x372   :  { %v702_v4 = vpop.permute.xlu1 %701 }
 0x373   :  { %v704_v5 = vsel %vm163_vm8, %v700_v34, %v702_v4  ;;  %v705_v30 = vsel %vm163_vm8, %v702_v4, %v695_v33 }
 0x374   :  { %v713_v6 = vmul.f32 %v704_v5, %v1443_v39  ;;  %v714_v7 = vmul.f32 %v705_v30, %v1447_v41  ;;  %v796_v41 = vmul.f32 %v787_v42, %v1462_v48 }
 0x376   :  { %v874_v34 = vsel %vm462_vm9, %v713_v6, %v838_v45  ;;  %v779_v33 = vpop.permute.xlu1 %778  ;;  %v875_v19 = vsel %vm462_vm9, %v714_v7, %v839_v24  ;;  %v861_v60 = vrot.slane %v796_v41, 4  ;;  %v804_v45 = vpop.permute.xlu0 %803  ;;  %v879_v7 = vsel %vm462_vm9, %v1624_v23, %v851_v62 }
 0x377   :  { %v887_v39 = vpack.c.bf16 %v875_v19, %v871_v27  ;;  %v886_v53 = vpack.c.bf16 %v874_v34, %v870_v22  ;;  %v786_v13 = vsel %vm334_vm12, %v779_v33, %v1696_v16  ;;  %v794_v16 = vsel %vm334_vm12, %v785_v9, %v779_v33 }
 0x378   :  { %v795_v36 = vmul.f32 %v786_v13, %v1484_v58  ;;  %v798_v31 = vmul.f32 %v794_v16, %v1524_v26 }
 0x379   :  { %953 = vmatprep.subr.bf16.mxu1 %v887_v39 }
 0x37a   :  { %954 = vmatpush1.bf16.msra.mxu1 %v886_v53  ;;  %v762_v47 = vpop.permute.xlu1 %761  ;;  %v860_v63 = vrot.slane %v795_v36, 4  ;;  %v863_v20 = vrot.slane %v798_v31, 4 }
 0x37b   :  { %v766_v8 = vsel %vm291_vm14, %v760_v2, %v762_v47 }
 0x37c   :  { %v775_v48 = vmul.f32 %v766_v8, %v1498_v56  ;;  %v797_v56 = vmul.f32 %v788_v40, %v1521_v10 }
 0x37e   :  { %v758_v29 = vpop.permute.xlu1 %757  ;;  %v881_v15 = vsel %vm462_vm9, %v775_v48, %v861_v60  ;;  %v862_v10 = vrot.slane %v797_v56, 4 }
 0x37f   :  { %v765_v21 = vsel %vm291_vm14, %v758_v29, %v760_v2  ;;  %v889_v58 = vpack.c.bf16 %v881_v15, %v877_v54 }
 0x380   :  { %v774_v4 = vmul.f32 %v765_v21, %v1504_v57 }
 0x381   :  { %914 = vmatprep.subr.bf16.mxu0 %v889_v58 }
 0x382   :  { %v880_v12 = vsel %vm462_vm9, %v774_v4, %v860_v63  ;;  %v764_v37 = vpop.permute.xlu1 %763 }
 0x383   :  { %v767_v2 = vsel %vm291_vm14, %v762_v47, %v764_v37  ;;  %v773_v5 = vsel %vm291_vm14, %v764_v37, %v758_v29  ;;  %v888_v30 = vpack.c.bf16 %v880_v12, %v876_v59  ;;  %v1037_v59 = vld [vmem:[%s1826_s7] sm:$0xf] }
 0x384   :  { %v776_v26 = vmul.f32 %v767_v2, %v1538_v49  ;;  %v777_v57 = vmul.f32 %v773_v5, %v1541_v14 }
 0x385   :  { %915 = vmatpush1.bf16.msra.mxu0 %v888_v30 }
 0x386   :  { %v882_v24 = vsel %vm462_vm9, %v776_v26, %v862_v10  ;;  %v802_v6 = vpop.permute.xlu1 %801  ;;  %v883_v43 = vsel %vm462_vm9, %v777_v57, %v863_v20 }
 0x387   :  { %v807_v22 = vsel %vm377_vm0, %v800_v55, %v802_v6  ;;  %v808_v42 = vsel %vm377_vm0, %v802_v6, %v804_v45  ;;  %v891_v49 = vpack.c.bf16 %v883_v43, %v879_v7  ;;  %v890_v25 = vpack.c.bf16 %v882_v24, %v878_v44  ;;  %v1022_v44 = vld [vmem:[%s1825_s6] sm:$0xf] }
 0x388   :  { %v816_v14 = vmul.f32 %v807_v22, %v1545_v11  ;;  %v817_v34 = vmul.f32 %v808_v42, %v1563_v35  ;;  %v896_v11 = vld [vmem:[%s1824_s5] sm:$0x3] }
 0x389   :  { %955 = vmatprep.subr.bf16.mxu1 %v891_v49 }
 0x38a   :  { %v892_v61 = vpack.c.bf16 %v816_v14, %v816_v14  ;;  %v893_v33 = vpack.c.bf16 %v817_v34, %v817_v34  ;;  %956 = vmatpush1.bf16.msra.mxu1 %v890_v25  ;;  %v806_v27 = vpop.permute.xlu1 %805 }
 0x38b   :  { %v809_v19 = vsel %vm377_vm0, %v804_v45, %v806_v27  ;;  %v815_v23 = vsel %vm377_vm0, %v806_v27, %v800_v55 }
 0x38c   :  { %v818_v39 = vmul.f32 %v809_v19, %v1566_v0  ;;  %v819_v53 = vmul.f32 %v815_v23, %v1557_v28  ;;  %1084 = vmatprep.subr.msk.bf16.mxu0 %vm496_vm1, %v893_v33  ;;  %v901_v41 = vsel %vm496_vm1, %v892_v61, 0  ;;  %v1108_v33 = vld [vmem:[%s1820_s1] sm:$0xff]  ;;  %v1109_v23 = vld [vmem:[%s1820_s1 + $0x8] sm:$0xff] }
 0x38d   :  { %917 = vmatpush1.bf16.msra.mxu0 %v901_v41 }
 0x38e   :  { %v894_v35 = vpack.c.bf16 %v818_v39, %v818_v39  ;;  %v895_v17 = vpack.c.bf16 %v819_v53, %v819_v53 }
 0x390   :  { %1085 = vmatmul.mubr.msk.bf16.vlgmr.msra.gmra.mrb[4].mxu0 %vm492_vm2, %v896_v11  ;;  %1086 = vmatprep.subr.msk.bf16.mxu1 %vm496_vm1, %v895_v17  ;;  %v907_v13 = vsel %vm496_vm1, %v894_v35, 0 }
 0x391   :  { %958 = vmatpush1.bf16.msra.mxu1 %v907_v13 }
 0x394   :  { %1087 = vmatmul.mubr.msk.bf16.vlgmr.msra.gmra.mrb[4].mxu1 %vm492_vm2, %v896_v11 }
 0x463   :  { %v946_v28 = vpop.f32.mrb[4].mxu0 }
 0x464   :  { %v994_v0 = vsel %vm462_vm9, %v946_v28, 0.0  ;;  %v1003_v9 = vmul.f32 %v946_v28, %v946_v28  ;;  %v948_v32 = vpop.f32.mrb[5].mxu0 }
 0x465   :  { %v995_v47 = vsel %vm462_vm9, %v948_v32, 0.0  ;;  %v1004_v46 = vmul.f32 %v948_v32, %v948_v32  ;;  %v950_v50 = vpop.f32.mrb[6].mxu0 }
 0x466   :  { %v1007_v8 = vsel %vm462_vm9, %v1003_v9, 0.0  ;;  %v996_v60 = vadd.f32 %v995_v47, %v994_v0  ;;  %v951_v36 = vpop.f32.mrb[7].mxu0 }
 0x467   :  { %v1008_v48 = vsel %vm462_vm9, %v1004_v46, 0.0  ;;  %v987_v52 = vpop.f32.mrb[4].mxu1 }
 0x468   :  { %v997_v40 = vsel %vm462_vm9, %v987_v52, 0.0  ;;  %v1005_v16 = vmul.f32 %v987_v52, %v987_v52  ;;  %v989_v18 = vpop.f32.mrb[5].mxu1  ;;  %v1009_v51 = vadd.f32 %v1008_v48, %v1007_v8 }
 0x469   :  { %v1006_v29 = vmul.f32 %v989_v18, %v989_v18  ;;  %v991_v54 = vpop.f32.mrb[6].mxu1  ;;  %v998_v15 = vadd.f32 %v997_v40, %v996_v60  ;;  %v999_v21 = vsel %vm462_vm9, %v989_v18, 0.0 }
 0x46a   :  { %v992_v58 = vpop.f32.mrb[7].mxu1  ;;  %v1010_v55 = vsel %vm462_vm9, %v1005_v16, 0.0 }
 0x46b   :  { %v1000_v56 = vadd.f32 %v999_v21, %v998_v15  ;;  %v1011_v31 = vadd.f32 %v1010_v55, %v1009_v51  ;;  %v1012_v63 = vsel %vm462_vm9, %v1006_v29, 0.0 }
 0x46d   :  { %1001 = vadd.xlane.f32.xlu0 %v1000_v56  ;;  %v1013_v4 = vadd.f32 %v1012_v63, %v1011_v31 }
 0x46f   :  { %1014 = vadd.xlane.f32.xlu1 %v1013_v4 }
 0x480   :  { %1040 = vperm.xlu1 %1101, %v1037_v59  }
 0x4fa   :  { %v1002_v62 = vpop.xlane.xlu0 %1001 }
 0x4fb   :  { %v1016_v38 = vmul.f32 0.001953125, %v1002_v62 }
 0x4fc   :  { %v1015_v12 = vpop.xlane.xlu1 %1014 }
 0x4fd   :  { %v1017_v37 = vmul.f32 0.001953125, %v1015_v12  ;;  %v1018_v2 = vmul.f32 %v1016_v38, %v1016_v38  ;;  %v1024_v5 = vsub.f32 %v946_v28, %v1016_v38  ;;  %v1025_v30 = vsub.f32 %v948_v32, %v1016_v38 }
 0x4fe   :  { %v1026_v10 = vsub.f32 %v987_v52, %v1016_v38  ;;  %v1027_v20 = vsub.f32 %v989_v18, %v1016_v38 }
 0x4ff   :  { %v1019_v26 = vsub.f32 %v1017_v37, %v1018_v2 }
 0x500   :  { %v1041_v49 = vpop.permute.xlu1 %1040 }
 0x501   :  { %v1020_v57 = vadd.f32 1e-05, %v1019_v26 }
 0x503   :  { %1106 = vrsqrt.f32 %v1020_v57 }
 0x50d   :  { %v1107_v45 = vpop.eup %1106 }
 0x50e   :  { %v1023_v24 = vmul.f32 %v1107_v45, %v1022_v44 }
 0x510   :  { %1030 = vperm.xlu0 %1100, %v1023_v24  }
 0x58f   :  { %v1031_v6 = vpop.permute.xlu0 %1030 }
 0x590   :  { %v1033_v7 = vmul.f32 %v1031_v6, %v1024_v5  ;;  %v1034_v43 = vmul.f32 %v1031_v6, %v1025_v30  ;;  %v1035_v22 = vmul.f32 %v1031_v6, %v1026_v10  ;;  %v1036_v42 = vmul.f32 %v1031_v6, %v1027_v20 }
 0x592   :  { %v1043_v25 = vadd.f32 %v1041_v49, %v1033_v7  ;;  %v1044_v14 = vadd.f32 %v1041_v49, %v1034_v43  ;;  %v1045_v34 = vadd.f32 %v1041_v49, %v1035_v22  ;;  %v1046_v61 = vadd.f32 %v1041_v49, %v1036_v42 }
 0x594   :  { %v1047_v27 = vadd.f32 %v1108_v33, %v1043_v25  ;;  %v1048_v19 = vadd.f32 %v1044_v14, %v1238_v1  ;;  %v1049_v39 = vadd.f32 %v1109_v23, %v1045_v34  ;;  %v1050_v53 = vadd.f32 %v1046_v61, %v1251_v3 }
 0x596   :  { %v1051_v41 = vmax.f32 %v1047_v27, 0.0  ;;  %v1052_v11 = vmax.f32 %v1048_v19, 0.0  ;;  %v1053_v35 = vmax.f32 %v1049_v39, 0.0  ;;  %v1054_v17 = vmax.f32 %v1050_v53, 0.0 }
 0x598   :  { %v1059_v13 = vcombine.low %v1051_v41, %v1052_v11  ;;  %v1060_v28 = vcombine.low %v1053_v35, %v1054_v17 }
 0x59a   :  { %1063 = vst [vmem:[#allocation5] sm:$0xff] %v1059_v13  ;;  %1064 = vst [vmem:[#allocation5 + $0x8] sm:$0xff] %v1060_v28 }
 0x59b   :  { %1143 = shalt.err (!%p1140_p12)
}
 0x59c   :  { %s1144_s20 = scalar_lea.hbm %s1827_s8, 256 }
 0x59d   :  { %p1145_p13 = scmp.ne.s32.totalorder %s1827_s8, %s1144_s20  ;;  %p1148_p0 = scmp.lt.u32.totalorder %s1144_s20, %s1827_s8 }
 0x59f   :  { %p1150_p1 = pnand %p1148_p0, %p1145_p13 }
 0x5a1   :  { %1153 = shalt.err (!%p1150_p1)
}
 0x5a2   :  { %1074 = dma.vmem_to_hbm [thread:$0]  %s1072_s17, 256, %s1827_s8, [#allocation4]  }
 0x5a3   :  { %1156 = dma.done.wait [#allocation4], 256  }
 0x5a4   :  { %1157 = vsyncadd [#allocation4], 4294967040 }
 0x5a5   :  { %1078 = vsyncpa [#allocation3], 1 }
 0x5a6   :  { %1079 = vsyncpa [#allocation4], 1 }

</bundles_post_ra>
